<compile_context>
chip_gen: v7x
topology: tpu7x:2x2x1
jax: 0.10.0
libtpu: 0.0.40
codegen_flags: <defaults>
</compile_context>

<pallas_src>
import functools

import jax
import jax.numpy as jnp
from jax.experimental import pallas as pl
from jax.experimental.pallas import tpu as pltpu


def _round_up(x, m):
    return (x + m - 1) // m * m


# ---------------------------------------------------------------------------
# UMNN kernel: step-packed monotonic transform on a lane-dense (1, tile_n) row
#   out = offset + integral_0^x (ELU(MLP(t)) + 1) dt      (midpoint rule)
# ---------------------------------------------------------------------------
def _umnn_kernel(nb_steps, x_ref, w1s_ref, b1_ref, w2t_ref, b2_ref, p3_ref,
                 b3_ref, off_ref, o_ref):
    S = nb_steps
    x = x_ref[...]                     # (1, tile_n) standardized scalars (lanes)
    b3 = b3_ref[0]                     # scalar (SMEM)
    off = off_ref[0]                   # scalar (SMEM)

    # ---- layer 1: all S quadrature steps at once ---------------------------
    # h1[s*H+h, n] = relu( (frac_s*w1[h]) * x[n] + b1[h] )  -- step axis packed
    # with H into the sublane axis of ONE dense tensor; no loop, no scratch.
    h1 = jnp.maximum(w1s_ref[...] * x + b1_ref[...], 0.0)        # (S*H, tile_n)

    # ---- layer 2: single K=N=S*H MXU matmul (block-diagonal w2^T) -----------
    # TODO(synk): bf16 operands (f32 accumulate) for ~2-4x MXU throughput.
    h2 = jnp.maximum(
        jnp.dot(w2t_ref[...], h1, preferred_element_type=jnp.float32)
        + b2_ref[...], 0.0)                                       # (S*H, tile_n)

    # ---- layer 3: block-column projection -> per-step integrand values ------
    gp = jnp.dot(p3_ref[...], h2,
                 preferred_element_type=jnp.float32) + b3         # (S, tile_n)
    g = jnp.where(gp > 0.0, gp,
                  jnp.exp(jnp.minimum(gp, 0.0)) - 1.0) + 1.0      # ELU(.) + 1

    # ---- midpoint quadrature: one sublane reduce over the S step rows -------
    acc = jnp.sum(g, axis=0, keepdims=True)                       # (1, tile_n)
    o_ref[...] = acc * (x * (1.0 / S)) + off                      # sum*dt + off


def monotonic_nn(x_flat, params, nb_steps, tile_n_max=2048):
    """Applies the UMNN elementwise to a flattened (N,) f32 vector."""
    N = x_flat.shape[0]
    H = params["w2"].shape[0]
    S = nb_steps
    SH = S * H

    # Lane-dense tiling of the flattened-scalar axis; cap tile_n at ~half the
    # (128-rounded) problem so multi-TC chips (v7x) always get >= 2 grid steps.
    n128 = _round_up(N, 128)
    tile_n = min(tile_n_max, n128)
    if n128 >= 256:
        tile_n = min(tile_n, _round_up(n128 // 2, 128))
    n_pad = _round_up(N, tile_n)
    n_rows = n_pad // tile_n
    x_rows = jnp.pad(x_flat, (0, n_pad - N)).reshape(n_rows, 1, tile_n)

    # Fold the midpoint-quadrature abscissa fractions into the layer-1 weights
    # and pack the step axis next to H (columns of shape (S*H, 1)).
    fracs = (jnp.arange(S, dtype=jnp.float32) + 0.5) / S                   # (S,)
    w1s_col = (fracs[:, None] * params["w1"][0][None, :]).reshape(SH, 1)
    b1_col = jnp.tile(params["b1"], (S, 1)).reshape(SH, 1)
    b2_col = jnp.tile(params["b2"], (S, 1)).reshape(SH, 1)
    eye_s = jnp.eye(S, dtype=jnp.float32)
    # Block-diagonal w2^T: (S*H, S*H) with w2.T on every diagonal block.
    w2t_bd = jnp.einsum("ab,ij->aibj", eye_s, params["w2"].T).reshape(SH, SH)
    # Block-column projection: row s holds w3^T in columns [s*H, (s+1)*H).
    p3 = (eye_s[:, :, None] * params["w3"][:, 0][None, None, :]).reshape(S, SH)

    kern = functools.partial(_umnn_kernel, S)
    out = pl.pallas_call(
        kern,
        out_shape=jax.ShapeDtypeStruct((n_rows, 1, tile_n), jnp.float32),
        grid=(n_rows,),
        in_specs=[
            pl.BlockSpec((None, 1, tile_n), lambda i: (i, 0, 0)),   # x row tile
            pl.BlockSpec((SH, 1), lambda i: (0, 0)),                # frac_s * w1
            pl.BlockSpec((SH, 1), lambda i: (0, 0)),                # b1 (tiled)
            pl.BlockSpec((SH, SH), lambda i: (0, 0)),               # blkdiag(w2^T)
            pl.BlockSpec((SH, 1), lambda i: (0, 0)),                # b2 (tiled)
            pl.BlockSpec((S, SH), lambda i: (0, 0)),                # w3 projection
            pl.BlockSpec(memory_space=pltpu.MemorySpace.SMEM),      # b3 (1,)
            pl.BlockSpec(memory_space=pltpu.MemorySpace.SMEM),      # offset (1,)
        ],
        out_specs=pl.BlockSpec((None, 1, tile_n), lambda i: (i, 0, 0)),
        compiler_params=pltpu.CompilerParams(
            dimension_semantics=("parallel",)),
    )(x_rows, w1s_col, b1_col, w2t_bd, b2_col, p3,
      params["b3"], params["offset"])
    return out.reshape(-1)[:N]


# ---------------------------------------------------------------------------
# Model wrapper
# ---------------------------------------------------------------------------
def monotonic_model_forward(logits, params, nb_steps, tile_n_max=2048):
    B, C = logits.shape
    # log-softmax + standardize: tiny O(B*C) op, done in plain JAX so XLA fuses
    # it with the flatten/pad (no separate Pallas launch, no extra reshape op).
    lse = jax.scipy.special.logsumexp(logits, axis=1, keepdims=True)
    xn = (logits - lse - params["meanlogit"][0]) / params["logitstd"][0]
    x_flat = xn.reshape(-1)               # row-major flatten == torch .view(-1)
    mono = monotonic_nn(x_flat, params, nb_steps, tile_n_max)       # (N,)
    return mono.reshape(B, C)


# ---------------------------------------------------------------------------
# Deterministic parameter init (torch.nn.Linear-style uniform)
# ---------------------------------------------------------------------------
def init_params(num_hiddens, seed=0):
    H = num_hiddens
    ks = jax.random.split(jax.random.PRNGKey(seed), 6)

    def u(k, shape, fan_in):
        bound = 1.0 / float(fan_in) ** 0.5
        return jax.random.uniform(k, shape, jnp.float32, -bound, bound)

    return dict(
        w1=u(ks[0], (1, H), 1),
        b1=u(ks[1], (1, H), 1),
        w2=u(ks[2], (H, H), H),
        b2=u(ks[3], (1, H), H),
        w3=u(ks[4], (H, 1), H),
        b3=u(ks[5], (1,), H),
        offset=jnp.zeros((1,), jnp.float32),
        meanlogit=jnp.zeros((1,), jnp.float32),   # non-trainable, torch.tensor([0.0])
        logitstd=jnp.ones((1,), jnp.float32),     # non-trainable, torch.tensor([1.0])
    )


# ---------------------------------------------------------------------------
# Pure-JAX reference (for correctness check)
# ---------------------------------------------------------------------------
def reference_forward(logits, params, nb_steps):
    lse = jax.scipy.special.logsumexp(logits, axis=1, keepdims=True)
    xn = ((logits - lse) - params["meanlogit"][0]) / params["logitstd"][0]
    x = xn.reshape(-1, 1)
    acc = jnp.zeros_like(x)
    for i in range(nb_steps):
        t = x * ((i + 0.5) / nb_steps)
        h1 = jnp.maximum(t @ params["w1"] + params["b1"], 0.0)
        h2 = jnp.maximum(h1 @ params["w2"] + params["b2"], 0.0)
        gp = h2 @ params["w3"] + params["b3"][0]
        acc = acc + jnp.where(gp > 0.0, gp, jnp.exp(gp) - 1.0) + 1.0
    out = acc * (x / nb_steps) + params["offset"][0]
    return out.reshape(logits.shape)


if __name__ == "__main__":
    B, C = 8, 16          # (batch_size, num_classes)
    NUM_HIDDENS = 32
    NB_STEPS = 8

    key = jax.random.PRNGKey(0)
    k1, k2, k3 = jax.random.split(key, 3)
    params = init_params(NUM_HIDDENS, seed=0)

    # Small single-tile case (N = 128 scalars exactly).
    logits = jax.random.normal(k1, (B, C), jnp.float32)
    out = jax.block_until_ready(monotonic_model_forward(logits, params, NB_STEPS))
    ref = reference_forward(logits, params, NB_STEPS)
    assert out.shape == logits.shape
    assert jnp.allclose(out, ref, atol=1e-4, rtol=1e-4)

    # Multi-tile path: N = 160*16 = 2560 scalars -> tile_n = 1280, grid of 2
    # "parallel" steps (both v7x TensorCores active).
    logits2 = jax.random.normal(k2, (160, 16), jnp.float32)
    out2 = jax.block_until_ready(monotonic_model_forward(logits2, params, NB_STEPS))
    ref2 = reference_forward(logits2, params, NB_STEPS)
    assert jnp.allclose(out2, ref2, atol=1e-4, rtol=1e-4)

    # Padding path: N = 100 -> padded to 128, padded lanes sliced off.
    logits3 = jax.random.normal(k3, (10, 10), jnp.float32)
    out3 = jax.block_until_ready(monotonic_model_forward(logits3, params, NB_STEPS))
    ref3 = reference_forward(logits3, params, NB_STEPS)
    assert jnp.allclose(out3, ref3, atol=1e-4, rtol=1e-4)

    print("KERNEL_OK")
</pallas_src>

<mosaic_0001>
module attributes {stable_mosaic.version = 11 : i64} {
  func.func @_umnn_kernel(%arg0: i32, %arg1: memref<1x1x128xf32, #tpu.memory_space<vmem>>, %arg2: memref<256x1xf32, #tpu.memory_space<vmem>>, %arg3: memref<256x1xf32, #tpu.memory_space<vmem>>, %arg4: memref<256x256xf32, #tpu.memory_space<vmem>>, %arg5: memref<256x1xf32, #tpu.memory_space<vmem>>, %arg6: memref<8x256xf32, #tpu.memory_space<vmem>>, %arg7: memref<1xf32, #tpu.memory_space<smem>>, %arg8: memref<1xf32, #tpu.memory_space<smem>>, %arg9: memref<1x1x128xf32, #tpu.memory_space<vmem>>) attributes {dimension_semantics = [#tpu.dimension_semantics<parallel>], iteration_bounds = array<i64: 1>, scalar_prefetch = 0 : i64, scratch_operands = 0 : i64, tpu.core_type = #tpu.core_type<tc>, window_params = [{transform_indices = @transform_0, window_bounds = array<i64: 1, 1, 128>}, {pipeline_mode = #tpu.pipeline_mode<synchronous>, transform_indices = @transform_1, window_bounds = array<i64: 256, 1>}, {pipeline_mode = #tpu.pipeline_mode<synchronous>, transform_indices = @transform_2, window_bounds = array<i64: 256, 1>}, {pipeline_mode = #tpu.pipeline_mode<synchronous>, transform_indices = @transform_3, window_bounds = array<i64: 256, 256>}, {pipeline_mode = #tpu.pipeline_mode<synchronous>, transform_indices = @transform_4, window_bounds = array<i64: 256, 1>}, {pipeline_mode = #tpu.pipeline_mode<synchronous>, transform_indices = @transform_5, window_bounds = array<i64: 8, 256>}, {transform_indices = @transform_6, window_bounds = array<i64: 1>}, {transform_indices = @transform_7, window_bounds = array<i64: 1>}, {transform_indices = @transform_8, window_bounds = array<i64: 1, 1, 128>}]} {
    %c0 = arith.constant 0 : index
    %c0_0 = arith.constant 0 : index
    %c0_1 = arith.constant 0 : index
    %0 = vector.load %arg1[%c0, %c0_0, %c0_1] : memref<1x1x128xf32, #tpu.memory_space<vmem>>, vector<1x1x128xf32>
    %1 = vector.shape_cast %0 : vector<1x1x128xf32> to vector<1x128xf32>
    %c0_2 = arith.constant 0 : index
    %2 = memref.load %arg7[%c0_2] : memref<1xf32, #tpu.memory_space<smem>>
    %c0_3 = arith.constant 0 : index
    %3 = memref.load %arg8[%c0_3] : memref<1xf32, #tpu.memory_space<smem>>
    %c0_4 = arith.constant 0 : index
    %c0_5 = arith.constant 0 : index
    %4 = vector.load %arg2[%c0_4, %c0_5] : memref<256x1xf32, #tpu.memory_space<vmem>>, vector<256x1xf32>
    %5 = vector.broadcast %4 : vector<256x1xf32> to vector<256x128xf32>
    %6 = vector.broadcast %1 : vector<1x128xf32> to vector<256x128xf32>
    %7 = arith.mulf %5, %6 : vector<256x128xf32>
    %c0_6 = arith.constant 0 : index
    %c0_7 = arith.constant 0 : index
    %8 = vector.load %arg3[%c0_6, %c0_7] : memref<256x1xf32, #tpu.memory_space<vmem>>, vector<256x1xf32>
    %9 = vector.broadcast %8 : vector<256x1xf32> to vector<256x128xf32>
    %10 = arith.addf %7, %9 : vector<256x128xf32>
    %cst = arith.constant 0.000000e+00 : f32
    %11 = vector.broadcast %cst : f32 to vector<256x128xf32>
    %12 = arith.maximumf %10, %11 : vector<256x128xf32>
    %c0_8 = arith.constant 0 : index
    %c0_9 = arith.constant 0 : index
    %13 = vector.load %arg4[%c0_8, %c0_9] : memref<256x256xf32, #tpu.memory_space<vmem>>, vector<256x256xf32>
    %cst_10 = arith.constant dense<0.000000e+00> : vector<256x128xf32>
    %14 = tpu.matmul %13, %12, %cst_10 {dimension_numbers = #tpu.dot_dimension_numbers<[1], [0], [0], [1], [0, 0, 1, 1], [], []>} : vector<256x256xf32>, vector<256x128xf32>, vector<256x128xf32> -> vector<256x128xf32>
    %c0_11 = arith.constant 0 : index
    %c0_12 = arith.constant 0 : index
    %15 = vector.load %arg5[%c0_11, %c0_12] : memref<256x1xf32, #tpu.memory_space<vmem>>, vector<256x1xf32>
    %16 = vector.broadcast %15 : vector<256x1xf32> to vector<256x128xf32>
    %17 = arith.addf %14, %16 : vector<256x128xf32>
    %cst_13 = arith.constant 0.000000e+00 : f32
    %18 = vector.broadcast %cst_13 : f32 to vector<256x128xf32>
    %19 = arith.maximumf %17, %18 : vector<256x128xf32>
    %c0_14 = arith.constant 0 : index
    %c0_15 = arith.constant 0 : index
    %20 = vector.load %arg6[%c0_14, %c0_15] : memref<8x256xf32, #tpu.memory_space<vmem>>, vector<8x256xf32>
    %cst_16 = arith.constant dense<0.000000e+00> : vector<8x128xf32>
    %21 = tpu.matmul %20, %19, %cst_16 {dimension_numbers = #tpu.dot_dimension_numbers<[1], [0], [0], [1], [0, 0, 1, 1], [], []>} : vector<8x256xf32>, vector<256x128xf32>, vector<8x128xf32> -> vector<8x128xf32>
    %22 = vector.broadcast %2 : f32 to vector<8x128xf32>
    %23 = arith.addf %21, %22 : vector<8x128xf32>
    %cst_17 = arith.constant 0.000000e+00 : f32
    %24 = vector.broadcast %cst_17 : f32 to vector<8x128xf32>
    %25 = arith.cmpf ogt, %23, %24 : vector<8x128xf32>
    %cst_18 = arith.constant 0.000000e+00 : f32
    %26 = vector.broadcast %cst_18 : f32 to vector<8x128xf32>
    %27 = arith.minimumf %23, %26 : vector<8x128xf32>
    %28 = math.exp %27 : vector<8x128xf32>
    %cst_19 = arith.constant 1.000000e+00 : f32
    %29 = vector.broadcast %cst_19 : f32 to vector<8x128xf32>
    %30 = arith.subf %28, %29 : vector<8x128xf32>
    %31 = arith.select %25, %23, %30 : vector<8x128xi1>, vector<8x128xf32>
    %cst_20 = arith.constant 1.000000e+00 : f32
    %32 = vector.broadcast %cst_20 : f32 to vector<8x128xf32>
    %33 = arith.addf %31, %32 : vector<8x128xf32>
    %cst_21 = arith.constant dense<0.000000e+00> : vector<128xf32>
    %34 = vector.multi_reduction <add>, %33, %cst_21 [0] : vector<8x128xf32> to vector<128xf32>
    %35 = vector.shape_cast %34 : vector<128xf32> to vector<1x128xf32>
    %cst_22 = arith.constant 1.250000e-01 : f32
    %36 = vector.broadcast %cst_22 : f32 to vector<1x128xf32>
    %37 = arith.mulf %1, %36 : vector<1x128xf32>
    %38 = arith.mulf %35, %37 : vector<1x128xf32>
    %39 = vector.broadcast %3 : f32 to vector<1x128xf32>
    %40 = arith.addf %38, %39 : vector<1x128xf32>
    %c0_23 = arith.constant 0 : index
    %c0_24 = arith.constant 0 : index
    %c0_25 = arith.constant 0 : index
    %41 = vector.load %arg9[%c0_23, %c0_24, %c0_25] : memref<1x1x128xf32, #tpu.memory_space<vmem>>, vector<1x1x128xf32>
    %42 = vector.shape_cast %41 : vector<1x1x128xf32> to vector<1x128xf32>
    %43 = vector.shape_cast %40 : vector<1x128xf32> to vector<1x1x128xf32>
    tpu.vector_store %arg9[%c0_23, %c0_24, %c0_25], %43 {strides = array<i32>} : memref<1x1x128xf32, #tpu.memory_space<vmem>>, vector<1x1x128xf32>,
    return
  }
  func.func @transform_0(%arg0: i32) -> (i32, i32, i32) {
    %c0_i32 = arith.constant 0 : i32
    %c0_i32_0 = arith.constant 0 : i32
    %c0_i32_1 = arith.constant 0 : i32
    return %arg0, %c0_i32, %c0_i32_0 : i32, i32, i32
  }
  func.func @transform_1(%arg0: i32) -> (i32, i32) {
    %c0_i32 = arith.constant 0 : i32
    %c0_i32_0 = arith.constant 0 : i32
    %c0_i32_1 = arith.constant 0 : i32
    return %c0_i32, %c0_i32_0 : i32, i32
  }
  func.func @transform_2(%arg0: i32) -> (i32, i32) {
    %c0_i32 = arith.constant 0 : i32
    %c0_i32_0 = arith.constant 0 : i32
    %c0_i32_1 = arith.constant 0 : i32
    return %c0_i32, %c0_i32_0 : i32, i32
  }
  func.func @transform_3(%arg0: i32) -> (i32, i32) {
    %c0_i32 = arith.constant 0 : i32
    %c0_i32_0 = arith.constant 0 : i32
    %c0_i32_1 = arith.constant 0 : i32
    return %c0_i32, %c0_i32_0 : i32, i32
  }
  func.func @transform_4(%arg0: i32) -> (i32, i32) {
    %c0_i32 = arith.constant 0 : i32
    %c0_i32_0 = arith.constant 0 : i32
    %c0_i32_1 = arith.constant 0 : i32
    return %c0_i32, %c0_i32_0 : i32, i32
  }
  func.func @transform_5(%arg0: i32) -> (i32, i32) {
    %c0_i32 = arith.constant 0 : i32
    %c0_i32_0 = arith.constant 0 : i32
    %c0_i32_1 = arith.constant 0 : i32
    return %c0_i32, %c0_i32_0 : i32, i32
  }
  func.func @transform_6(%arg0: i32) -> i32 {
    %c0_i32 = arith.constant 0 : i32
    %c0_i32_0 = arith.constant 0 : i32
    return %c0_i32 : i32
  }
  func.func @transform_7(%arg0: i32) -> i32 {
    %c0_i32 = arith.constant 0 : i32
    %c0_i32_0 = arith.constant 0 : i32
    return %c0_i32 : i32
  }
  func.func @transform_8(%arg0: i32) -> (i32, i32, i32) {
    %c0_i32 = arith.constant 0 : i32
    %c0_i32_0 = arith.constant 0 : i32
    %c0_i32_1 = arith.constant 0 : i32
    return %arg0, %c0_i32, %c0_i32_0 : i32, i32, i32
  }
}

</mosaic_0001>

<bundles_post_ra>
// kernel: tpu_custom_call.1
= control target key start
LH: loop header
LB: loop body
LE: loop exit
PB: predicated region body
PF: predicated region fallthrough
CT: control target
= control target key end

     0   :  { %v1320_v2 = vmov 0   ;;  %v1321_v9 = vmov 0.0|0.0   ;;  %s1992_s0 = inlined_call_operand.vmem [shape: f32[1,1,128], index: 0, kind: input, shape index: {}]   ;;  %s1993_s1 = inlined_call_operand.vmem [shape: f32[256,1], index: 1, kind: input, shape index: {}]   ;;  %s1994_s2 = inlined_call_operand.vmem [shape: f32[256,1], index: 2, kind: input, shape index: {}]   ;;  %s1995_s3 = inlined_call_operand.vmem [shape: f32[256,256], index: 3, kind: input, shape index: {}]   ;;  %s1996_s4 = inlined_call_operand.vmem [shape: f32[256,1], index: 4, kind: input, shape index: {}]   ;;  %s1997_s5 = inlined_call_operand.vmem [shape: f32[8,256], index: 5, kind: input, shape index: {}]   ;;  %s1998_s6 = inlined_call_operand.<no memory space> [shape: f32[1], index: 6, kind: input, shape index: {}]   ;;  %s1999_s7 = inlined_call_operand.<no memory space> [shape: f32[1], index: 7, kind: input, shape index: {}]   ;;  %s2000_s8 = inlined_call_operand.hbm [shape: f32[1,1,128], index: 8, kind: output, shape index: {}]  }
   0x1   :  { %v265_v0 = vld [vmem:[%s1994_s2] sm:$0xff]  ;;  %1291 = vset.pattern.permute.xlu1 %v1320_v2  ;;  %1290 = vset.pattern.permute.xlu0 %v1320_v2  ;;  %v266_v3 = vld [vmem:[%s1994_s2 + $0x8] sm:$0xff]  ;;  %v38_v5 = vld [vmem:[%s1993_s1 + $0x18] sm:$0xff] }
   0x2   :  { %v35_v1 = vld [vmem:[%s1993_s1] sm:$0xff]  ;;  %299 = vperm.xlu1 %1291, %v265_v0   ;;  %v36_v4 = vld [vmem:[%s1993_s1 + $0x8] sm:$0xff]  ;;  %v37_v6 = vld [vmem:[%s1993_s1 + $0x10] sm:$0xff]  ;;  %1175 = vmatprep.subr.bf16.mxu0 %v1321_v9 }
   0x3   :  { %69 = vperm.xlu0 %1290, %v35_v1   ;;  %v268_v7 = vld [vmem:[%s1994_s2 + $0x18] sm:$0xff]  ;;  %v267_v8 = vld [vmem:[%s1994_s2 + $0x10] sm:$0xff]  ;;  %1255 = vmatprep.subr.bf16.mxu1 %v1321_v9  ;;  %v40_v10 = vld [vmem:[%s1993_s1 + $0x28] sm:$0xff] }
   0x4   :  { %v39_v11 = vld [vmem:[%s1993_s1 + $0x20] sm:$0xff]  ;;  %v270_v12 = vld [vmem:[%s1994_s2 + $0x28] sm:$0xff]  ;;  %v42_v14 = vld [vmem:[%s1993_s1 + $0x38] sm:$0xff] }
   0x5   :  { %v269_v13 = vld [vmem:[%s1994_s2 + $0x20] sm:$0xff]  ;;  %v41_v15 = vld [vmem:[%s1993_s1 + $0x30] sm:$0xff] }
   0x6   :  { %304 = vperm.xlu1 %1291, %v266_v3  }
   0x7   :  { %74 = vperm.xlu0 %1290, %v36_v4  }
   0xa   :  { %84 = vperm.xlu1 %1291, %v38_v5  }
   0xb   :  { %79 = vperm.xlu0 %1290, %v37_v6  }
   0xe   :  { %314 = vperm.xlu1 %1291, %v268_v7  }
   0xf   :  { %309 = vperm.xlu0 %1290, %v267_v8  }
  0x12   :  { %94 = vperm.xlu1 %1291, %v40_v10  }
  0x13   :  { %89 = vperm.xlu0 %1290, %v39_v11  }
  0x16   :  { %324 = vperm.xlu1 %1291, %v270_v12  }
  0x17   :  { %319 = vperm.xlu0 %1290, %v269_v13  }
  0x18   :  { %15 = vsyncpa [#allocation5], 0  ;;  %v272_v16 = vld [vmem:[%s1994_s2 + $0x38] sm:$0xff]  ;;  %v271_v17 = vld [vmem:[%s1994_s2 + $0x30] sm:$0xff]  ;;  %s1322_s26 = smov [#allocation4]  }
  0x19   :  { %v44_v18 = vld [vmem:[%s1993_s1 + $0x48] sm:$0xff]  ;;  %v43_v19 = vld [vmem:[%s1993_s1 + $0x40] sm:$0xff]  ;;  %v46_v22 = vld [vmem:[%s1993_s1 + $0x58] sm:$0xff] }
  0x1a   :  { %104 = vperm.xlu1 %1291, %v42_v14   ;;  %v274_v20 = vld [vmem:[%s1994_s2 + $0x48] sm:$0xff]  ;;  %v273_v21 = vld [vmem:[%s1994_s2 + $0x40] sm:$0xff]  ;;  %v45_v23 = vld [vmem:[%s1993_s1 + $0x50] sm:$0xff] }
  0x1b   :  { %99 = vperm.xlu0 %1290, %v41_v15   ;;  %v276_v24 = vld [vmem:[%s1994_s2 + $0x58] sm:$0xff]  ;;  %v275_v25 = vld [vmem:[%s1994_s2 + $0x50] sm:$0xff]  ;;  %v48_v26 = vld [vmem:[%s1993_s1 + $0x68] sm:$0xff] }
  0x1c   :  { %v47_v27 = vld [vmem:[%s1993_s1 + $0x60] sm:$0xff]  ;;  %v278_v28 = vld [vmem:[%s1994_s2 + $0x68] sm:$0xff]  ;;  %v50_v30 = vld [vmem:[%s1993_s1 + $0x78] sm:$0xff] }
  0x1d   :  { %v277_v29 = vld [vmem:[%s1994_s2 + $0x60] sm:$0xff]  ;;  %v49_v31 = vld [vmem:[%s1993_s1 + $0x70] sm:$0xff]  ;;  %v280_v32 = vld [vmem:[%s1994_s2 + $0x78] sm:$0xff] }
  0x1e   :  { %334 = vperm.xlu1 %1291, %v272_v16   ;;  %v279_v33 = vld [vmem:[%s1994_s2 + $0x70] sm:$0xff]  ;;  %v52_v34 = vld [vmem:[%s1993_s1 + $0x88] sm:$0xff]  ;;  %v51_v35 = vld [vmem:[%s1993_s1 + $0x80] sm:$0xff] }
  0x1f   :  { %329 = vperm.xlu0 %1290, %v271_v17   ;;  %v282_v36 = vld [vmem:[%s1994_s2 + $0x88] sm:$0xff]  ;;  %v281_v37 = vld [vmem:[%s1994_s2 + $0x80] sm:$0xff]  ;;  %v54_v38 = vld [vmem:[%s1993_s1 + $0x98] sm:$0xff] }
  0x20   :  { %v53_v39 = vld [vmem:[%s1993_s1 + $0x90] sm:$0xff]  ;;  %v284_v40 = vld [vmem:[%s1994_s2 + $0x98] sm:$0xff]  ;;  %v56_v42 = vld [vmem:[%s1993_s1 + $0xa8] sm:$0xff] }
  0x21   :  { %v283_v41 = vld [vmem:[%s1994_s2 + $0x90] sm:$0xff]  ;;  %v55_v43 = vld [vmem:[%s1993_s1 + $0xa0] sm:$0xff]  ;;  %v286_v44 = vld [vmem:[%s1994_s2 + $0xa8] sm:$0xff] }
  0x22   :  { %114 = vperm.xlu1 %1291, %v44_v18   ;;  %v285_v45 = vld [vmem:[%s1994_s2 + $0xa0] sm:$0xff]  ;;  %v58_v46 = vld [vmem:[%s1993_s1 + $0xb8] sm:$0xff]  ;;  %v57_v47 = vld [vmem:[%s1993_s1 + $0xb0] sm:$0xff] }
  0x23   :  { %109 = vperm.xlu0 %1290, %v43_v19   ;;  %v288_v48 = vld [vmem:[%s1994_s2 + $0xb8] sm:$0xff]  ;;  %v287_v49 = vld [vmem:[%s1994_s2 + $0xb0] sm:$0xff]  ;;  %v60_v50 = vld [vmem:[%s1993_s1 + $0xc8] sm:$0xff] }
  0x24   :  { %v59_v51 = vld [vmem:[%s1993_s1 + $0xc0] sm:$0xff]  ;;  %v290_v52 = vld [vmem:[%s1994_s2 + $0xc8] sm:$0xff]  ;;  %v62_v54 = vld [vmem:[%s1993_s1 + $0xd8] sm:$0xff] }
  0x25   :  { %v289_v53 = vld [vmem:[%s1994_s2 + $0xc0] sm:$0xff]  ;;  %v61_v55 = vld [vmem:[%s1993_s1 + $0xd0] sm:$0xff]  ;;  %v292_v56 = vld [vmem:[%s1994_s2 + $0xd8] sm:$0xff] }
  0x26   :  { %344 = vperm.xlu1 %1291, %v274_v20   ;;  %v291_v57 = vld [vmem:[%s1994_s2 + $0xd0] sm:$0xff]  ;;  %v64_v58 = vld [vmem:[%s1993_s1 + $0xe8] sm:$0xff]  ;;  %v63_v59 = vld [vmem:[%s1993_s1 + $0xe0] sm:$0xff] }
  0x27   :  { %339 = vperm.xlu0 %1290, %v273_v21   ;;  %v294_v60 = vld [vmem:[%s1994_s2 + $0xe8] sm:$0xff]  ;;  %v293_v61 = vld [vmem:[%s1994_s2 + $0xe0] sm:$0xff]  ;;  %v66_v62 = vld [vmem:[%s1993_s1 + $0xf8] sm:$0xff] }
  0x28   :  { %v65_v63 = vld [vmem:[%s1993_s1 + $0xf0] sm:$0xff]  ;;  %v296_v0 = vld [vmem:[%s1994_s2 + $0xf8] sm:$0xff]  ;;  %v1565_v2 = vld [vmem:[%s1992_s0] ss:$0 sm:$0xff]  ;;  %s1131_s1 = sshll.u32 %s1322_s26, 4  ;;  %s1132_s1 = int_to_ptr.vmem [resolvable:$true] %s1131_s1 }
  0x29   :  { %v295_v1 = vld [vmem:[%s1994_s2 + $0xf0] sm:$0xff]  ;;  %v602_v3 = vld [vmem:[%s1996_s4 + $0x88] sm:$0xff]  ;;  %v601_v4 = vld [vmem:[%s1996_s4 + $0x80] sm:$0xff]  ;;  %s1296_s27 = scalar_lea.vmem %s1132_s1, 16  ;;  %s1300_s2 = scalar_lea.vmem %s1132_s1, 32 }
  0x2a   :  { %124 = vperm.xlu1 %1291, %v46_v22   ;;  %v586_v8 = vld [vmem:[%s1996_s4 + $0x8] sm:$0xff]  ;;  %v585_v10 = vld [vmem:[%s1996_s4] sm:$0xff]  ;;  %v556_v14 = vld [vmem:[%s1995_s3 + $0x118] sm:$0xff]  ;;  %p1297_p0 = scmp.ne.s32.totalorder %s1132_s1, %s1296_s27  ;;  %p1301_p1 = scmp.lt.s32.totalorder %s1132_s1, %s1132_s1 }
  0x2b   :  { %119 = vperm.xlu0 %1290, %v45_v23   ;;  %v522_v13 = vld [vmem:[%s1995_s3 + $0x8] sm:$0xff]  ;;  %v604_v17 = vld [vmem:[%s1996_s4 + $0x98] sm:$0xff]  ;;  %v603_v18 = vld [vmem:[%s1996_s4 + $0x90] sm:$0xff]  ;;  %926 = vmatprep.mubr.f32.mxu1 %v556_v14  ;;  %p1302_p2 = scmp.lt.s32.totalorder %s1300_s2, %s1296_s27 }
  0x2c   :  { %841 = vmatprep.mubr.f32.mxu0 %v522_v13 }
  0x2d   :  { %p1303_p3 = por %p1302_p2, %p1301_p1 }
  0x2e   :  { %354 = vperm.xlu1 %1291, %v276_v24   ;;  %v588_v24 = vld [vmem:[%s1996_s4 + $0x18] sm:$0xff] }
  0x2f   :  { %349 = vperm.xlu0 %1290, %v275_v25   ;;  %v587_v25 = vld [vmem:[%s1996_s4 + $0x10] sm:$0xff]  ;;  %p1304_p4 = pnand %p1303_p3, %p1297_p0 }
  0x32   :  { %134 = vperm.xlu1 %1291, %v48_v26  }
  0x33   :  { %129 = vperm.xlu0 %1290, %v47_v27  }
  0x36   :  { %364 = vperm.xlu1 %1291, %v278_v28  }
  0x37   :  { %359 = vperm.xlu0 %1290, %v277_v29  }
  0x3a   :  { %144 = vperm.xlu1 %1291, %v50_v30  }
  0x3b   :  { %139 = vperm.xlu0 %1290, %v49_v31  }
  0x3e   :  { %374 = vperm.xlu1 %1291, %v280_v32  }
  0x3f   :  { %369 = vperm.xlu0 %1290, %v279_v33   ;;  %v606_v33 = vld [vmem:[%s1996_s4 + $0xa8] sm:$0xff] }
  0x42   :  { %154 = vperm.xlu1 %1291, %v52_v34   ;;  %v605_v34 = vld [vmem:[%s1996_s4 + $0xa0] sm:$0xff] }
  0x43   :  { %149 = vperm.xlu0 %1290, %v51_v35  }
  0x46   :  { %384 = vperm.xlu1 %1291, %v282_v36  }
  0x47   :  { %379 = vperm.xlu0 %1290, %v281_v37  }
  0x4a   :  { %164 = vperm.xlu1 %1291, %v54_v38  }
  0x4b   :  { %159 = vperm.xlu0 %1290, %v53_v39  }
  0x4e   :  { %394 = vperm.xlu1 %1291, %v284_v40   ;;  %v590_v40 = vld [vmem:[%s1996_s4 + $0x28] sm:$0xff] }
  0x4f   :  { %389 = vperm.xlu0 %1290, %v283_v41   ;;  %v589_v41 = vld [vmem:[%s1996_s4 + $0x20] sm:$0xff] }
  0x52   :  { %174 = vperm.xlu1 %1291, %v56_v42  }
  0x53   :  { %169 = vperm.xlu0 %1290, %v55_v43  }
  0x56   :  { %404 = vperm.xlu1 %1291, %v286_v44  }
  0x57   :  { %399 = vperm.xlu0 %1290, %v285_v45  }
  0x5a   :  { %184 = vperm.xlu1 %1291, %v58_v46  }
  0x5b   :  { %179 = vperm.xlu0 %1290, %v57_v47  }
  0x5e   :  { %414 = vperm.xlu1 %1291, %v288_v48   ;;  %v608_v48 = vld [vmem:[%s1996_s4 + $0xb8] sm:$0xff] }
  0x5f   :  { %409 = vperm.xlu0 %1290, %v287_v49   ;;  %v607_v49 = vld [vmem:[%s1996_s4 + $0xb0] sm:$0xff] }
  0x62   :  { %194 = vperm.xlu1 %1291, %v60_v50  }
  0x63   :  { %189 = vperm.xlu0 %1290, %v59_v51  }
  0x66   :  { %424 = vperm.xlu1 %1291, %v290_v52  }
  0x67   :  { %419 = vperm.xlu0 %1290, %v289_v53  }
  0x6a   :  { %204 = vperm.xlu1 %1291, %v62_v54  }
  0x6b   :  { %199 = vperm.xlu0 %1290, %v61_v55   ;;  %v592_v55 = vld [vmem:[%s1996_s4 + $0x38] sm:$0xff] }
  0x6e   :  { %434 = vperm.xlu1 %1291, %v292_v56   ;;  %v591_v56 = vld [vmem:[%s1996_s4 + $0x30] sm:$0xff] }
  0x6f   :  { %429 = vperm.xlu0 %1290, %v291_v57  }
  0x72   :  { %214 = vperm.xlu1 %1291, %v64_v58  }
  0x73   :  { %209 = vperm.xlu0 %1290, %v63_v59  }
  0x76   :  { %444 = vperm.xlu1 %1291, %v294_v60  }
  0x77   :  { %439 = vperm.xlu0 %1290, %v293_v61  }
  0x7a   :  { %224 = vperm.xlu1 %1291, %v66_v62  }
  0x7b   :  { %219 = vperm.xlu0 %1290, %v65_v63   ;;  %v610_v63 = vld [vmem:[%s1996_s4 + $0xc8] sm:$0xff] }
  0x7e   :  { %454 = vperm.xlu1 %1291, %v296_v0   ;;  %v609_v0 = vld [vmem:[%s1996_s4 + $0xc0] sm:$0xff] }
  0x7f   :  { %449 = vperm.xlu0 %1290, %v295_v1  }
  0x81   :  { %v300_v5 = vpop.permute.xlu1 %299 }
  0x82   :  { %v70_v6 = vpop.permute.xlu0 %69  ;;  %704 = vperm.xlu1 %1291, %v602_v3  }
  0x83   :  { %v233_v7 = vmul.f32 %v1565_v2, %v70_v6  ;;  %699 = vperm.xlu0 %1290, %v601_v4  }
  0x85   :  { %v305_v11 = vpop.permute.xlu1 %304  ;;  %v457_v15 = vadd.f32 %v300_v5, %v233_v7  ;;  %v594_v7 = vld [vmem:[%s1996_s4 + $0x48] sm:$0xff] }
  0x86   :  { %v75_v12 = vpop.permute.xlu0 %74  ;;  %624 = vperm.xlu1 %1291, %v586_v8   ;;  %v593_v8 = vld [vmem:[%s1996_s4 + $0x40] sm:$0xff] }
  0x87   :  { %v234_v16 = vmul.f32 %v1565_v2, %v75_v12  ;;  %619 = vperm.xlu0 %1290, %v585_v10   ;;  %v489_v22 = vmax.f32 %v457_v15, 0.0 }
  0x89   :  { %v458_v19 = vadd.f32 %v305_v11, %v234_v16  ;;  %v85_v20 = vpop.permute.xlu1 %84  ;;  %v612_v16 = vld [vmem:[%s1996_s4 + $0xd8] sm:$0xff] }
  0x8a   :  { %v80_v21 = vpop.permute.xlu0 %79  ;;  %714 = vperm.xlu1 %1291, %v604_v17   ;;  %v236_v26 = vmul.f32 %v1565_v2, %v85_v20  ;;  %v611_v17 = vld [vmem:[%s1996_s4 + $0xd0] sm:$0xff] }
  0x8b   :  { %v490_v23 = vmax.f32 %v458_v19, 0.0  ;;  %709 = vperm.xlu0 %1290, %v603_v18   ;;  %v235_v27 = vmul.f32 %v1565_v2, %v80_v21 }
  0x8d   :  { %v1176_v28 = vpack.c.bf16 %v490_v23, %v489_v22  ;;  %v315_v29 = vpop.permute.xlu1 %314  ;;  %v596_v23 = vld [vmem:[%s1996_s4 + $0x58] sm:$0xff] }
  0x8e   :  { %v310_v30 = vpop.permute.xlu0 %309  ;;  %v460_v31 = vadd.f32 %v315_v29, %v236_v26  ;;  %634 = vperm.xlu1 %1291, %v588_v24   ;;  %v595_v24 = vld [vmem:[%s1996_s4 + $0x50] sm:$0xff] }
  0x8f   :  { %v459_v32 = vadd.f32 %v310_v30, %v235_v27  ;;  %629 = vperm.xlu0 %1290, %v587_v25   ;;  %1177 = vmatpush1.bf16.msra.mxu0 %v1176_v28 }
  0x90   :  { %1271 = vmatpush1.bf16.msra.mxu1 %v1176_v28  ;;  %v492_v35 = vmax.f32 %v460_v31, 0.0  ;;  %1178 = vmatprep.subr.bf16.mxu0 %v1321_v9  ;;  %v614_v31 = vld [vmem:[%s1996_s4 + $0xe8] sm:$0xff] }
  0x91   :  { %v491_v36 = vmax.f32 %v459_v32, 0.0  ;;  %1256 = vmatprep.subr.bf16.mxu1 %v1321_v9  ;;  %v95_v37 = vpop.permute.xlu1 %94  ;;  %v613_v32 = vld [vmem:[%s1996_s4 + $0xe0] sm:$0xff] }
  0x92   :  { %v90_v38 = vpop.permute.xlu0 %89  ;;  %724 = vperm.xlu1 %1291, %v606_v33   ;;  %v238_v42 = vmul.f32 %v1565_v2, %v95_v37 }
  0x93   :  { %v1179_v39 = vpack.c.bf16 %v492_v35, %v491_v36  ;;  %719 = vperm.xlu0 %1290, %v605_v34   ;;  %v237_v43 = vmul.f32 %v1565_v2, %v90_v38  ;;  %v598_v38 = vld [vmem:[%s1996_s4 + $0x68] sm:$0xff] }
  0x95   :  { %1180 = vmatpush1.bf16.msra.mxu0 %v1179_v39  ;;  %1272 = vmatpush1.bf16.msra.mxu1 %v1179_v39  ;;  %v325_v44 = vpop.permute.xlu1 %324  ;;  %v597_v39 = vld [vmem:[%s1996_s4 + $0x60] sm:$0xff] }
  0x96   :  { %v320_v45 = vpop.permute.xlu0 %319  ;;  %1181 = vmatprep.subr.bf16.mxu0 %v1321_v9  ;;  %1257 = vmatprep.subr.bf16.mxu1 %v1321_v9  ;;  %v462_v46 = vadd.f32 %v325_v44, %v238_v42 }
  0x97   :  { %v461_v47 = vadd.f32 %v320_v45, %v237_v43  ;;  %644 = vperm.xlu1 %1291, %v590_v40   ;;  %639 = vperm.xlu0 %1290, %v589_v41  }
  0x98   :  { %v494_v50 = vmax.f32 %v462_v46, 0.0  ;;  %v616_v46 = vld [vmem:[%s1996_s4 + $0xf8] sm:$0xff] }
  0x99   :  { %v493_v51 = vmax.f32 %v461_v47, 0.0  ;;  %v105_v52 = vpop.permute.xlu1 %104  ;;  %v615_v47 = vld [vmem:[%s1996_s4 + $0xf0] sm:$0xff] }
  0x9a   :  { %v100_v53 = vpop.permute.xlu0 %99  ;;  %v240_v57 = vmul.f32 %v1565_v2, %v105_v52 }
  0x9b   :  { %v1182_v54 = vpack.c.bf16 %v494_v50, %v493_v51  ;;  %734 = vperm.xlu1 %1291, %v608_v48   ;;  %729 = vperm.xlu0 %1290, %v607_v49   ;;  %v239_v58 = vmul.f32 %v1565_v2, %v100_v53  ;;  %v600_v53 = vld [vmem:[%s1996_s4 + $0x78] sm:$0xff] }
  0x9d   :  { %1183 = vmatpush1.bf16.msra.mxu0 %v1182_v54  ;;  %1273 = vmatpush1.bf16.msra.mxu1 %v1182_v54  ;;  %v335_v59 = vpop.permute.xlu1 %334  ;;  %v599_v54 = vld [vmem:[%s1996_s4 + $0x70] sm:$0xff] }
  0x9e   :  { %v330_v60 = vpop.permute.xlu0 %329  ;;  %1184 = vmatprep.subr.bf16.mxu0 %v1321_v9  ;;  %1258 = vmatprep.subr.bf16.mxu1 %v1321_v9  ;;  %v464_v61 = vadd.f32 %v335_v59, %v240_v57 }
  0x9f   :  { %v463_v62 = vadd.f32 %v330_v60, %v239_v58  ;;  %654 = vperm.xlu1 %1291, %v592_v55   ;;  %649 = vperm.xlu0 %1290, %v591_v56  }
  0xa0   :  { %v496_v1 = vmax.f32 %v464_v61, 0.0 }
  0xa1   :  { %v495_v3 = vmax.f32 %v463_v62, 0.0  ;;  %v115_v4 = vpop.permute.xlu1 %114 }
  0xa2   :  { %v110_v5 = vpop.permute.xlu0 %109  ;;  %v242_v10 = vmul.f32 %v1565_v2, %v115_v4 }
  0xa3   :  { %v1185_v6 = vpack.c.bf16 %v496_v1, %v495_v3  ;;  %744 = vperm.xlu1 %1291, %v610_v63   ;;  %739 = vperm.xlu0 %1290, %v609_v0   ;;  %v241_v11 = vmul.f32 %v1565_v2, %v110_v5 }
  0xa5   :  { %1186 = vmatpush1.bf16.msra.mxu0 %v1185_v6  ;;  %1274 = vmatpush1.bf16.msra.mxu1 %v1185_v6  ;;  %v345_v12 = vpop.permute.xlu1 %344 }
  0xa6   :  { %v340_v13 = vpop.permute.xlu0 %339  ;;  %1187 = vmatprep.subr.bf16.mxu0 %v1321_v9  ;;  %1259 = vmatprep.subr.bf16.mxu1 %v1321_v9  ;;  %v466_v14 = vadd.f32 %v345_v12, %v242_v10 }
  0xa7   :  { %v465_v15 = vadd.f32 %v340_v13, %v241_v11  ;;  %664 = vperm.xlu1 %1291, %v594_v7   ;;  %659 = vperm.xlu0 %1290, %v593_v8  }
  0xa8   :  { %v498_v18 = vmax.f32 %v466_v14, 0.0 }
  0xa9   :  { %v497_v19 = vmax.f32 %v465_v15, 0.0  ;;  %v125_v20 = vpop.permute.xlu1 %124 }
  0xaa   :  { %v120_v21 = vpop.permute.xlu0 %119  ;;  %v244_v25 = vmul.f32 %v1565_v2, %v125_v20 }
  0xab   :  { %v1188_v22 = vpack.c.bf16 %v498_v18, %v497_v19  ;;  %754 = vperm.xlu1 %1291, %v612_v16   ;;  %749 = vperm.xlu0 %1290, %v611_v17   ;;  %v243_v26 = vmul.f32 %v1565_v2, %v120_v21 }
  0xad   :  { %1189 = vmatpush1.bf16.msra.mxu0 %v1188_v22  ;;  %1275 = vmatpush1.bf16.msra.mxu1 %v1188_v22  ;;  %v355_v27 = vpop.permute.xlu1 %354 }
  0xae   :  { %v350_v28 = vpop.permute.xlu0 %349  ;;  %1190 = vmatprep.subr.bf16.mxu0 %v1321_v9  ;;  %1260 = vmatprep.subr.bf16.mxu1 %v1321_v9  ;;  %v468_v29 = vadd.f32 %v355_v27, %v244_v25 }
  0xaf   :  { %v467_v30 = vadd.f32 %v350_v28, %v243_v26  ;;  %674 = vperm.xlu1 %1291, %v596_v23   ;;  %669 = vperm.xlu0 %1290, %v595_v24  }
  0xb0   :  { %v500_v33 = vmax.f32 %v468_v29, 0.0 }
  0xb1   :  { %v499_v34 = vmax.f32 %v467_v30, 0.0  ;;  %v135_v35 = vpop.permute.xlu1 %134 }
  0xb2   :  { %v130_v36 = vpop.permute.xlu0 %129  ;;  %v246_v40 = vmul.f32 %v1565_v2, %v135_v35 }
  0xb3   :  { %v1191_v37 = vpack.c.bf16 %v500_v33, %v499_v34  ;;  %764 = vperm.xlu1 %1291, %v614_v31   ;;  %759 = vperm.xlu0 %1290, %v613_v32   ;;  %v245_v41 = vmul.f32 %v1565_v2, %v130_v36 }
  0xb5   :  { %1192 = vmatpush1.bf16.msra.mxu0 %v1191_v37  ;;  %1276 = vmatpush1.bf16.msra.mxu1 %v1191_v37  ;;  %v365_v42 = vpop.permute.xlu1 %364 }
  0xb6   :  { %v360_v43 = vpop.permute.xlu0 %359  ;;  %1193 = vmatprep.subr.bf16.mxu0 %v1321_v9  ;;  %1261 = vmatprep.subr.bf16.mxu1 %v1321_v9  ;;  %v470_v44 = vadd.f32 %v365_v42, %v246_v40 }
  0xb7   :  { %v469_v45 = vadd.f32 %v360_v43, %v245_v41  ;;  %684 = vperm.xlu1 %1291, %v598_v38   ;;  %679 = vperm.xlu0 %1290, %v597_v39  }
  0xb8   :  { %v502_v48 = vmax.f32 %v470_v44, 0.0 }
  0xb9   :  { %v501_v49 = vmax.f32 %v469_v45, 0.0  ;;  %v145_v50 = vpop.permute.xlu1 %144 }
  0xba   :  { %v140_v51 = vpop.permute.xlu0 %139  ;;  %v248_v55 = vmul.f32 %v1565_v2, %v145_v50 }
  0xbb   :  { %v1194_v52 = vpack.c.bf16 %v502_v48, %v501_v49  ;;  %774 = vperm.xlu1 %1291, %v616_v46   ;;  %769 = vperm.xlu0 %1290, %v615_v47   ;;  %v247_v56 = vmul.f32 %v1565_v2, %v140_v51 }
  0xbd   :  { %1195 = vmatpush1.bf16.msra.mxu0 %v1194_v52  ;;  %1277 = vmatpush1.bf16.msra.mxu1 %v1194_v52  ;;  %v375_v57 = vpop.permute.xlu1 %374 }
  0xbe   :  { %v370_v58 = vpop.permute.xlu0 %369  ;;  %1196 = vmatprep.subr.bf16.mxu0 %v1321_v9  ;;  %1262 = vmatprep.subr.bf16.mxu1 %v1321_v9  ;;  %v472_v59 = vadd.f32 %v375_v57, %v248_v55 }
  0xbf   :  { %v471_v60 = vadd.f32 %v370_v58, %v247_v56  ;;  %694 = vperm.xlu1 %1291, %v600_v53   ;;  %689 = vperm.xlu0 %1290, %v599_v54  }
  0xc0   :  { %v504_v61 = vmax.f32 %v472_v59, 0.0 }
  0xc1   :  { %v503_v62 = vmax.f32 %v471_v60, 0.0  ;;  %v155_v63 = vpop.permute.xlu1 %154 }
  0xc2   :  { %v150_v0 = vpop.permute.xlu0 %149  ;;  %v250_v3 = vmul.f32 %v1565_v2, %v155_v63 }
  0xc3   :  { %v1197_v1 = vpack.c.bf16 %v504_v61, %v503_v62  ;;  %v249_v4 = vmul.f32 %v1565_v2, %v150_v0 }
  0xc5   :  { %1198 = vmatpush1.bf16.msra.mxu0 %v1197_v1  ;;  %1278 = vmatpush1.bf16.msra.mxu1 %v1197_v1  ;;  %v385_v5 = vpop.permute.xlu1 %384 }
  0xc6   :  { %v380_v6 = vpop.permute.xlu0 %379  ;;  %1199 = vmatprep.subr.bf16.mxu0 %v1321_v9  ;;  %1263 = vmatprep.subr.bf16.mxu1 %v1321_v9  ;;  %v474_v7 = vadd.f32 %v385_v5, %v250_v3 }
  0xc7   :  { %v473_v8 = vadd.f32 %v380_v6, %v249_v4 }
  0xc8   :  { %v506_v10 = vmax.f32 %v474_v7, 0.0 }
  0xc9   :  { %v505_v11 = vmax.f32 %v473_v8, 0.0  ;;  %v165_v12 = vpop.permute.xlu1 %164 }
  0xca   :  { %v160_v13 = vpop.permute.xlu0 %159  ;;  %v252_v15 = vmul.f32 %v1565_v2, %v165_v12 }
  0xcb   :  { %v1200_v14 = vpack.c.bf16 %v506_v10, %v505_v11  ;;  %v251_v16 = vmul.f32 %v1565_v2, %v160_v13 }
  0xcd   :  { %1201 = vmatpush1.bf16.msra.mxu0 %v1200_v14  ;;  %1279 = vmatpush1.bf16.msra.mxu1 %v1200_v14  ;;  %v395_v17 = vpop.permute.xlu1 %394 }
  0xce   :  { %v390_v18 = vpop.permute.xlu0 %389  ;;  %1202 = vmatprep.subr.bf16.mxu0 %v1321_v9  ;;  %1264 = vmatprep.subr.bf16.mxu1 %v1321_v9  ;;  %v476_v19 = vadd.f32 %v395_v17, %v252_v15 }
  0xcf   :  { %v475_v20 = vadd.f32 %v390_v18, %v251_v16 }
  0xd0   :  { %v508_v21 = vmax.f32 %v476_v19, 0.0 }
  0xd1   :  { %v507_v22 = vmax.f32 %v475_v20, 0.0  ;;  %v175_v23 = vpop.permute.xlu1 %174 }
  0xd2   :  { %v170_v24 = vpop.permute.xlu0 %169  ;;  %v254_v26 = vmul.f32 %v1565_v2, %v175_v23 }
  0xd3   :  { %v1203_v25 = vpack.c.bf16 %v508_v21, %v507_v22  ;;  %v253_v27 = vmul.f32 %v1565_v2, %v170_v24 }
  0xd5   :  { %1204 = vmatpush1.bf16.msra.mxu0 %v1203_v25  ;;  %1280 = vmatpush1.bf16.msra.mxu1 %v1203_v25  ;;  %v405_v28 = vpop.permute.xlu1 %404 }
  0xd6   :  { %v400_v29 = vpop.permute.xlu0 %399  ;;  %1205 = vmatprep.subr.bf16.mxu0 %v1321_v9  ;;  %1265 = vmatprep.subr.bf16.mxu1 %v1321_v9  ;;  %v478_v30 = vadd.f32 %v405_v28, %v254_v26  ;;  %v521_v28 = vld [vmem:[%s1995_s3] sm:$0xff] }
  0xd7   :  { %v477_v31 = vadd.f32 %v400_v29, %v253_v27  ;;  %v524_v29 = vld [vmem:[%s1995_s3 + $0x18] sm:$0xff] }
  0xd8   :  { %v510_v32 = vmax.f32 %v478_v30, 0.0  ;;  %v523_v30 = vld [vmem:[%s1995_s3 + $0x10] sm:$0xff] }
  0xd9   :  { %v509_v33 = vmax.f32 %v477_v31, 0.0  ;;  %v185_v34 = vpop.permute.xlu1 %184  ;;  %v557_v31 = vld [vmem:[%s1995_s3 + $0x120] sm:$0xff] }
  0xda   :  { %v180_v35 = vpop.permute.xlu0 %179  ;;  %v256_v37 = vmul.f32 %v1565_v2, %v185_v34  ;;  %v525_v34 = vld [vmem:[%s1995_s3 + $0x20] sm:$0xff] }
  0xdb   :  { %v1206_v36 = vpack.c.bf16 %v510_v32, %v509_v33  ;;  %v255_v38 = vmul.f32 %v1565_v2, %v180_v35  ;;  %v526_v32 = vld [vmem:[%s1995_s3 + $0x28] sm:$0xff]  ;;  %v560_v33 = vld [vmem:[%s1995_s3 + $0x138] sm:$0xff]  ;;  %v559_v35 = vld [vmem:[%s1995_s3 + $0x130] sm:$0xff] }
  0xdd   :  { %1207 = vmatpush1.bf16.msra.mxu0 %v1206_v36  ;;  %1281 = vmatpush1.bf16.msra.mxu1 %v1206_v36  ;;  %v415_v39 = vpop.permute.xlu1 %414  ;;  %v528_v36 = vld [vmem:[%s1995_s3 + $0x38] sm:$0xff] }
  0xde   :  { %v410_v40 = vpop.permute.xlu0 %409  ;;  %1208 = vmatprep.subr.bf16.mxu0 %v1321_v9  ;;  %1266 = vmatprep.subr.bf16.mxu1 %v1321_v9  ;;  %v480_v41 = vadd.f32 %v415_v39, %v256_v37  ;;  %v562_v37 = vld [vmem:[%s1995_s3 + $0x148] sm:$0xff]  ;;  %v561_v39 = vld [vmem:[%s1995_s3 + $0x140] sm:$0xff] }
  0xdf   :  { %v479_v42 = vadd.f32 %v410_v40, %v255_v38  ;;  %v527_v38 = vld [vmem:[%s1995_s3 + $0x30] sm:$0xff]  ;;  %v530_v40 = vld [vmem:[%s1995_s3 + $0x48] sm:$0xff] }
  0xe0   :  { %v512_v43 = vmax.f32 %v480_v41, 0.0  ;;  %v564_v41 = vld [vmem:[%s1995_s3 + $0x158] sm:$0xff] }
  0xe1   :  { %v511_v44 = vmax.f32 %v479_v42, 0.0  ;;  %v195_v45 = vpop.permute.xlu1 %194  ;;  %v529_v42 = vld [vmem:[%s1995_s3 + $0x40] sm:$0xff] }
  0xe2   :  { %v190_v46 = vpop.permute.xlu0 %189  ;;  %v258_v48 = vmul.f32 %v1565_v2, %v195_v45  ;;  %v566_v45 = vld [vmem:[%s1995_s3 + $0x168] sm:$0xff] }
  0xe3   :  { %v1209_v47 = vpack.c.bf16 %v512_v43, %v511_v44  ;;  %v257_v49 = vmul.f32 %v1565_v2, %v190_v46  ;;  %v563_v43 = vld [vmem:[%s1995_s3 + $0x150] sm:$0xff]  ;;  %v532_v44 = vld [vmem:[%s1995_s3 + $0x58] sm:$0xff] }
  0xe4   :  { %v531_v46 = vld [vmem:[%s1995_s3 + $0x50] sm:$0xff] }
  0xe5   :  { %1210 = vmatpush1.bf16.msra.mxu0 %v1209_v47  ;;  %1282 = vmatpush1.bf16.msra.mxu1 %v1209_v47  ;;  %v425_v50 = vpop.permute.xlu1 %424  ;;  %v565_v47 = vld [vmem:[%s1995_s3 + $0x160] sm:$0xff] }
  0xe6   :  { %v420_v51 = vpop.permute.xlu0 %419  ;;  %1211 = vmatprep.subr.bf16.mxu0 %v1321_v9  ;;  %1267 = vmatprep.subr.bf16.mxu1 %v1321_v9  ;;  %v482_v52 = vadd.f32 %v425_v50, %v258_v48  ;;  %v534_v48 = vld [vmem:[%s1995_s3 + $0x68] sm:$0xff]  ;;  %v533_v50 = vld [vmem:[%s1995_s3 + $0x60] sm:$0xff] }
  0xe7   :  { %v481_v53 = vadd.f32 %v420_v51, %v257_v49  ;;  %v568_v49 = vld [vmem:[%s1995_s3 + $0x178] sm:$0xff]  ;;  %v567_v51 = vld [vmem:[%s1995_s3 + $0x170] sm:$0xff] }
  0xe8   :  { %v514_v54 = vmax.f32 %v482_v52, 0.0  ;;  %v536_v52 = vld [vmem:[%s1995_s3 + $0x78] sm:$0xff] }
  0xe9   :  { %v513_v55 = vmax.f32 %v481_v53, 0.0  ;;  %v205_v56 = vpop.permute.xlu1 %204  ;;  %v570_v53 = vld [vmem:[%s1995_s3 + $0x188] sm:$0xff] }
  0xea   :  { %v200_v57 = vpop.permute.xlu0 %199  ;;  %v260_v59 = vmul.f32 %v1565_v2, %v205_v56  ;;  %v538_v56 = vld [vmem:[%s1995_s3 + $0x88] sm:$0xff] }
  0xeb   :  { %v1212_v58 = vpack.c.bf16 %v514_v54, %v513_v55  ;;  %v259_v60 = vmul.f32 %v1565_v2, %v200_v57  ;;  %v535_v54 = vld [vmem:[%s1995_s3 + $0x70] sm:$0xff]  ;;  %v569_v55 = vld [vmem:[%s1995_s3 + $0x180] sm:$0xff]  ;;  %v572_v57 = vld [vmem:[%s1995_s3 + $0x198] sm:$0xff] }
  0xed   :  { %1213 = vmatpush1.bf16.msra.mxu0 %v1212_v58  ;;  %1283 = vmatpush1.bf16.msra.mxu1 %v1212_v58  ;;  %v435_v61 = vpop.permute.xlu1 %434  ;;  %v537_v58 = vld [vmem:[%s1995_s3 + $0x80] sm:$0xff] }
  0xee   :  { %v430_v62 = vpop.permute.xlu0 %429  ;;  %1214 = vmatprep.subr.bf16.mxu0 %v1321_v9  ;;  %1268 = vmatprep.subr.bf16.mxu1 %v1321_v9  ;;  %v484_v63 = vadd.f32 %v435_v61, %v260_v59  ;;  %v571_v59 = vld [vmem:[%s1995_s3 + $0x190] sm:$0xff]  ;;  %v574_v61 = vld [vmem:[%s1995_s3 + $0x1a8] sm:$0xff] }
  0xef   :  { %v483_v0 = vadd.f32 %v430_v62, %v259_v60  ;;  %v540_v60 = vld [vmem:[%s1995_s3 + $0x98] sm:$0xff]  ;;  %v539_v62 = vld [vmem:[%s1995_s3 + $0x90] sm:$0xff] }
  0xf0   :  { %v516_v1 = vmax.f32 %v484_v63, 0.0  ;;  %v573_v63 = vld [vmem:[%s1995_s3 + $0x1a0] sm:$0xff] }
  0xf1   :  { %v515_v3 = vmax.f32 %v483_v0, 0.0  ;;  %v215_v4 = vpop.permute.xlu1 %214  ;;  %v542_v0 = vld [vmem:[%s1995_s3 + $0xa8] sm:$0xff] }
  0xf2   :  { %v210_v5 = vpop.permute.xlu0 %209  ;;  %v262_v7 = vmul.f32 %v1565_v2, %v215_v4  ;;  %v575_v4 = vld [vmem:[%s1995_s3 + $0x1b0] sm:$0xff] }
  0xf3   :  { %v1215_v6 = vpack.c.bf16 %v516_v1, %v515_v3  ;;  %v261_v8 = vmul.f32 %v1565_v2, %v210_v5  ;;  %v576_v1 = vld [vmem:[%s1995_s3 + $0x1b8] sm:$0xff]  ;;  %v541_v3 = vld [vmem:[%s1995_s3 + $0xa0] sm:$0xff] }
  0xf4   :  { %v544_v5 = vld [vmem:[%s1995_s3 + $0xb8] sm:$0xff] }
  0xf5   :  { %1216 = vmatpush1.bf16.msra.mxu0 %v1215_v6  ;;  %1284 = vmatpush1.bf16.msra.mxu1 %v1215_v6  ;;  %v445_v10 = vpop.permute.xlu1 %444  ;;  %v578_v6 = vld [vmem:[%s1995_s3 + $0x1c8] sm:$0xff] }
  0xf6   :  { %v440_v11 = vpop.permute.xlu0 %439  ;;  %1217 = vmatprep.subr.bf16.mxu0 %v1321_v9  ;;  %1269 = vmatprep.subr.bf16.mxu1 %v1321_v9  ;;  %v486_v12 = vadd.f32 %v445_v10, %v262_v7  ;;  %v543_v7 = vld [vmem:[%s1995_s3 + $0xb0] sm:$0xff]  ;;  %v546_v10 = vld [vmem:[%s1995_s3 + $0xc8] sm:$0xff] }
  0xf7   :  { %v485_v13 = vadd.f32 %v440_v11, %v261_v8  ;;  %v577_v8 = vld [vmem:[%s1995_s3 + $0x1c0] sm:$0xff]  ;;  %v580_v11 = vld [vmem:[%s1995_s3 + $0x1d8] sm:$0xff] }
  0xf8   :  { %v518_v14 = vmax.f32 %v486_v12, 0.0  ;;  %v545_v12 = vld [vmem:[%s1995_s3 + $0xc0] sm:$0xff] }
  0xf9   :  { %v517_v15 = vmax.f32 %v485_v13, 0.0  ;;  %v225_v16 = vpop.permute.xlu1 %224  ;;  %v579_v13 = vld [vmem:[%s1995_s3 + $0x1d0] sm:$0xff] }
  0xfa   :  { %v220_v17 = vpop.permute.xlu0 %219  ;;  %v264_v19 = vmul.f32 %v1565_v2, %v225_v16  ;;  %v547_v16 = vld [vmem:[%s1995_s3 + $0xd0] sm:$0xff] }
  0xfb   :  { %v1218_v18 = vpack.c.bf16 %v518_v14, %v517_v15  ;;  %v263_v20 = vmul.f32 %v1565_v2, %v220_v17  ;;  %v555_v2 = vld [vmem:[%s1995_s3 + $0x110] sm:$0xff]  ;;  %v548_v14 = vld [vmem:[%s1995_s3 + $0xd8] sm:$0xff]  ;;  %v582_v15 = vld [vmem:[%s1995_s3 + $0x1e8] sm:$0xff] }
  0xfc   :  { %v581_v17 = vld [vmem:[%s1995_s3 + $0x1e0] sm:$0xff] }
  0xfd   :  { %1219 = vmatpush1.bf16.msra.mxu0 %v1218_v18  ;;  %1285 = vmatpush1.bf16.msra.mxu1 %v1218_v18  ;;  %v455_v21 = vpop.permute.xlu1 %454  ;;  %v550_v18 = vld [vmem:[%s1995_s3 + $0xe8] sm:$0xff] }
  0xfe   :  { %v450_v22 = vpop.permute.xlu0 %449  ;;  %1220 = vmatprep.subr.bf16.mxu0 %v1321_v9  ;;  %1270 = vmatprep.subr.bf16.mxu1 %v1321_v9  ;;  %v488_v23 = vadd.f32 %v455_v21, %v264_v19  ;;  %v558_v9 = vld [vmem:[%s1995_s3 + $0x128] sm:$0xff]  ;;  %v584_v19 = vld [vmem:[%s1995_s3 + $0x1f8] sm:$0xff]  ;;  %v583_v21 = vld [vmem:[%s1995_s3 + $0x1f0] sm:$0xff] }
  0xff   :  { %v487_v24 = vadd.f32 %v450_v22, %v263_v20  ;;  %v549_v20 = vld [vmem:[%s1995_s3 + $0xe0] sm:$0xff]  ;;  %v552_v22 = vld [vmem:[%s1995_s3 + $0xf8] sm:$0xff] }
 0x100   :  { %v520_v25 = vmax.f32 %v488_v23, 0.0  ;;  %v551_v23 = vld [vmem:[%s1995_s3 + $0xf0] sm:$0xff] }
 0x101   :  { %v519_v26 = vmax.f32 %v487_v24, 0.0  ;;  %v554_v24 = vld [vmem:[%s1995_s3 + $0x108] sm:$0xff] }
 0x103   :  { %v1221_v27 = vpack.c.bf16 %v520_v25, %v519_v26  ;;  %v553_v25 = vld [vmem:[%s1995_s3 + $0x100] sm:$0xff]  ;;  %v1917_v26 = vpop.permute.xlu0 %699 }
 0x105   :  { %1222 = vmatpush1.bf16.msra.mxu0 %v1221_v27  ;;  %1286 = vmatpush1.bf16.msra.mxu1 %v1221_v27  ;;  %v1919_v27 = vpop.permute.xlu1 %704 }
 0x108   :  { %842 = vmatmul.mubr.f32.vlgmr.msra.gmra.mrb[0].mxu0 %v521_v28  ;;  %927 = vmatmul.mubr.f32.vlgmr.msra.gmra.mrb[0].mxu1 %v555_v2  ;;  %v620_v28 = vpop.permute.xlu0 %619 }
 0x109   :  { %846 = vmatprep.mubr.f32.mxu0 %v524_v29  ;;  %931 = vmatprep.mubr.f32.mxu1 %v558_v9  ;;  %v625_v2 = vpop.permute.xlu1 %624 }
 0x10c   :  { %847 = vmatmul.mubr.f32.gmra.mrb[2].mxu0 %v523_v30  ;;  %932 = vmatmul.mubr.f32.gmra.mrb[2].mxu1 %v557_v31  ;;  %v710_v29 = vpop.permute.xlu0 %709  ;;  %v1035_v30 = vld [vmem:[%s1997_s5 + $0x8] sm:$0xff] }
 0x10d   :  { %851 = vmatprep.mubr.f32.mxu0 %v526_v32  ;;  %936 = vmatprep.mubr.f32.mxu1 %v560_v33  ;;  %v715_v9 = vpop.permute.xlu1 %714 }
 0x110   :  { %852 = vmatmul.mubr.f32.gmra.mrb[4].mxu0 %v525_v34  ;;  %937 = vmatmul.mubr.f32.gmra.mrb[4].mxu1 %v559_v35  ;;  %v630_v31 = vpop.permute.xlu0 %629 }
 0x111   :  { %856 = vmatprep.mubr.f32.mxu0 %v528_v36  ;;  %941 = vmatprep.mubr.f32.mxu1 %v562_v37  ;;  %v635_v32 = vpop.permute.xlu1 %634 }
 0x114   :  { %857 = vmatmul.mubr.f32.gmra.mrb[6].mxu0 %v527_v38  ;;  %942 = vmatmul.mubr.f32.gmra.mrb[6].mxu1 %v561_v39  ;;  %v720_v33 = vpop.permute.xlu0 %719 }
 0x115   :  { %861 = vmatprep.mubr.f32.mxu0 %v530_v40  ;;  %946 = vmatprep.mubr.f32.mxu1 %v564_v41  ;;  %v725_v34 = vpop.permute.xlu1 %724 }
 0x118   :  { %862 = vmatmul.mubr.f32.gmra.mrb[8].mxu0 %v529_v42  ;;  %947 = vmatmul.mubr.f32.gmra.mrb[8].mxu1 %v563_v43  ;;  %v640_v35 = vpop.permute.xlu0 %639 }
 0x119   :  { %866 = vmatprep.mubr.f32.mxu0 %v532_v44  ;;  %951 = vmatprep.mubr.f32.mxu1 %v566_v45  ;;  %v645_v36 = vpop.permute.xlu1 %644 }
 0x11c   :  { %867 = vmatmul.mubr.f32.gmra.mrb[10].mxu0 %v531_v46  ;;  %952 = vmatmul.mubr.f32.gmra.mrb[10].mxu1 %v565_v47  ;;  %v730_v37 = vpop.permute.xlu0 %729 }
 0x11d   :  { %871 = vmatprep.mubr.f32.mxu0 %v534_v48  ;;  %956 = vmatprep.mubr.f32.mxu1 %v568_v49  ;;  %v735_v38 = vpop.permute.xlu1 %734 }
 0x120   :  { %872 = vmatmul.mubr.f32.gmra.mrb[12].mxu0 %v533_v50  ;;  %957 = vmatmul.mubr.f32.gmra.mrb[12].mxu1 %v567_v51  ;;  %v1924_v39 = vpop.permute.xlu0 %649 }
 0x121   :  { %876 = vmatprep.mubr.f32.mxu0 %v536_v52  ;;  %961 = vmatprep.mubr.f32.mxu1 %v570_v53  ;;  %v1926_v40 = vpop.permute.xlu1 %654 }
 0x124   :  { %877 = vmatmul.mubr.f32.gmra.mrb[14].mxu0 %v535_v54  ;;  %962 = vmatmul.mubr.f32.gmra.mrb[14].mxu1 %v569_v55  ;;  %v1930_v45 = vpop.permute.xlu0 %739 }
 0x125   :  { %881 = vmatprep.mubr.f32.mxu0 %v538_v56  ;;  %966 = vmatprep.mubr.f32.mxu1 %v572_v57  ;;  %v1932_v52 = vpop.permute.xlu1 %744 }
 0x128   :  { %882 = vmatmul.mubr.f32.gmra.mrb[16].mxu0 %v537_v58  ;;  %967 = vmatmul.mubr.f32.gmra.mrb[16].mxu1 %v571_v59 }
 0x129   :  { %886 = vmatprep.mubr.f32.mxu0 %v540_v60  ;;  %971 = vmatprep.mubr.f32.mxu1 %v574_v61 }
 0x12c   :  { %887 = vmatmul.mubr.f32.gmra.mrb[18].mxu0 %v539_v62  ;;  %972 = vmatmul.mubr.f32.gmra.mrb[18].mxu1 %v573_v63  ;;  %v660_v62 = vpop.permute.xlu0 %659 }
 0x12d   :  { %891 = vmatprep.mubr.f32.mxu0 %v542_v0  ;;  %976 = vmatprep.mubr.f32.mxu1 %v576_v1 }
 0x130   :  { %892 = vmatmul.mubr.f32.gmra.mrb[20].mxu0 %v541_v3  ;;  %977 = vmatmul.mubr.f32.gmra.mrb[20].mxu1 %v575_v4 }
 0x131   :  { %896 = vmatprep.mubr.f32.mxu0 %v544_v5  ;;  %981 = vmatprep.mubr.f32.mxu1 %v578_v6 }
 0x134   :  { %897 = vmatmul.mubr.f32.gmra.mrb[22].mxu0 %v543_v7  ;;  %982 = vmatmul.mubr.f32.gmra.mrb[22].mxu1 %v577_v8 }
 0x135   :  { %901 = vmatprep.mubr.f32.mxu0 %v546_v10  ;;  %986 = vmatprep.mubr.f32.mxu1 %v580_v11  ;;  %v665_v10 = vpop.permute.xlu1 %664 }
 0x138   :  { %902 = vmatmul.mubr.f32.gmra.mrb[24].mxu0 %v545_v12  ;;  %987 = vmatmul.mubr.f32.gmra.mrb[24].mxu1 %v579_v13 }
 0x139   :  { %906 = vmatprep.mubr.f32.mxu0 %v548_v14  ;;  %991 = vmatprep.mubr.f32.mxu1 %v582_v15 }
 0x13c   :  { %907 = vmatmul.mubr.f32.gmra.mrb[26].mxu0 %v547_v16  ;;  %992 = vmatmul.mubr.f32.gmra.mrb[26].mxu1 %v581_v17 }
 0x13d   :  { %911 = vmatprep.mubr.f32.mxu0 %v550_v18  ;;  %996 = vmatprep.mubr.f32.mxu1 %v584_v19 }
 0x140   :  { %912 = vmatmul.mubr.f32.gmra.mrb[28].mxu0 %v549_v20  ;;  %997 = vmatmul.mubr.f32.gmra.mrb[28].mxu1 %v583_v21  ;;  %v750_v20 = vpop.permute.xlu0 %749 }
 0x141   :  { %916 = vmatprep.mubr.f32.mxu0 %v552_v22  ;;  %1101 = vmatprep.mubr.f32.mxu1 %v1035_v30  ;;  %v755_v30 = vpop.permute.xlu1 %754 }
 0x144   :  { %917 = vmatmul.mubr.f32.gmra.mrb[30].mxu0 %v551_v23 }
 0x145   :  { %921 = vmatprep.mubr.f32.mxu0 %v554_v24 }
 0x148   :  { %922 = vmatmul.mubr.f32.gmra.mrb[32].mxu0 %v553_v25 }
 0x1db   :  { %v843_v41 = vpop.f32.mrb[0].mxu0  ;;  %v1928_v42 = vpop.f32.mrb[0].mxu1 }
 0x1dc   :  { %v845_v43 = vpop.f32.mrb[1].mxu0  ;;  %v930_v44 = vpop.f32.mrb[1].mxu1  ;;  %v844_v46 = vadd.f32 %v843_v41, %v620_v28 }
 0x1de   :  { %v1002_v53 = vmax.f32 %v844_v46, 0.0 }
 0x1df   :  { %v848_v47 = vpop.f32.mrb[2].mxu0  ;;  %v933_v48 = vpop.f32.mrb[2].mxu1 }
 0x1e0   :  { %v849_v49 = vadd.f32 %v848_v47, %v625_v2  ;;  %v850_v50 = vpop.f32.mrb[3].mxu0  ;;  %v935_v51 = vpop.f32.mrb[3].mxu1  ;;  %v934_v55 = vadd.f32 %v933_v48, %v710_v29 }
 0x1e2   :  { %v1003_v54 = vmax.f32 %v849_v49, 0.0  ;;  %v1020_v63 = vmax.f32 %v934_v55, 0.0 }
 0x1e3   :  { %v853_v56 = vpop.f32.mrb[4].mxu0  ;;  %v938_v57 = vpop.f32.mrb[4].mxu1 }
 0x1e4   :  { %v1934_v58 = vpack.c.bf16 %v1003_v54, %v1002_v53  ;;  %v939_v59 = vadd.f32 %v938_v57, %v715_v9  ;;  %v855_v60 = vpop.f32.mrb[5].mxu0  ;;  %v940_v61 = vpop.f32.mrb[5].mxu1  ;;  %v854_v0 = vadd.f32 %v853_v56, %v630_v31 }
 0x1e5   :  { %v675_v56 = vpop.permute.xlu1 %674 }
 0x1e6   :  { %v1021_v1 = vmax.f32 %v939_v59, 0.0  ;;  %v1004_v11 = vmax.f32 %v854_v0, 0.0 }
 0x1e7   :  { %v858_v3 = vpop.f32.mrb[6].mxu0  ;;  %v943_v4 = vpop.f32.mrb[6].mxu1 }
 0x1e8   :  { %v1936_v5 = vpack.c.bf16 %v1021_v1, %v1020_v63  ;;  %v859_v6 = vadd.f32 %v858_v3, %v635_v32  ;;  %v860_v7 = vpop.f32.mrb[7].mxu0  ;;  %v945_v8 = vpop.f32.mrb[7].mxu1  ;;  %v944_v13 = vadd.f32 %v943_v4, %v720_v33 }
 0x1ea   :  { %v1005_v12 = vmax.f32 %v859_v6, 0.0  ;;  %v1022_v21 = vmax.f32 %v944_v13, 0.0 }
 0x1eb   :  { %v863_v14 = vpop.f32.mrb[8].mxu0  ;;  %v948_v15 = vpop.f32.mrb[8].mxu1 }
 0x1ec   :  { %v1938_v16 = vpack.c.bf16 %v1005_v12, %v1004_v11  ;;  %v949_v17 = vadd.f32 %v948_v15, %v725_v34  ;;  %v865_v18 = vpop.f32.mrb[9].mxu0  ;;  %v950_v19 = vpop.f32.mrb[9].mxu1  ;;  %v864_v22 = vadd.f32 %v863_v14, %v640_v35 }
 0x1ed   :  { %v670_v35 = vpop.permute.xlu0 %669 }
 0x1ee   :  { %v1023_v23 = vmax.f32 %v949_v17, 0.0  ;;  %v1006_v31 = vmax.f32 %v864_v22, 0.0 }
 0x1ef   :  { %v868_v24 = vpop.f32.mrb[10].mxu0  ;;  %v953_v25 = vpop.f32.mrb[10].mxu1 }
 0x1f0   :  { %v1940_v28 = vpack.c.bf16 %v1023_v23, %v1022_v21  ;;  %v869_v2 = vadd.f32 %v868_v24, %v645_v36  ;;  %v870_v29 = vpop.f32.mrb[11].mxu0  ;;  %v955_v9 = vpop.f32.mrb[11].mxu1  ;;  %v954_v33 = vadd.f32 %v953_v25, %v730_v37 }
 0x1f1   :  { %v760_v3 = vpop.permute.xlu0 %759 }
 0x1f2   :  { %v1007_v32 = vmax.f32 %v869_v2, 0.0  ;;  %v1024_v48 = vmax.f32 %v954_v33, 0.0 }
 0x1f3   :  { %v873_v41 = vpop.f32.mrb[12].mxu0  ;;  %v958_v43 = vpop.f32.mrb[12].mxu1 }
 0x1f4   :  { %v1942_v34 = vpack.c.bf16 %v1007_v32, %v1006_v31  ;;  %v959_v44 = vadd.f32 %v958_v43, %v735_v38  ;;  %v875_v46 = vpop.f32.mrb[13].mxu0  ;;  %v960_v47 = vpop.f32.mrb[13].mxu1  ;;  %v874_v49 = vadd.f32 %v873_v41, %v1924_v39 }
 0x1f6   :  { %v1025_v50 = vmax.f32 %v959_v44, 0.0  ;;  %v1008_v57 = vmax.f32 %v874_v49, 0.0 }
 0x1f7   :  { %v878_v51 = vpop.f32.mrb[14].mxu0  ;;  %v963_v36 = vpop.f32.mrb[14].mxu1 }
 0x1f8   :  { %v1945_v53 = vpack.c.bf16 %v1025_v50, %v1024_v48  ;;  %v879_v54 = vadd.f32 %v878_v51, %v1926_v40  ;;  %v880_v55 = vpop.f32.mrb[15].mxu0  ;;  %v965_v37 = vpop.f32.mrb[15].mxu1  ;;  %v964_v38 = vadd.f32 %v963_v36, %v1930_v45 }
 0x1f9   :  { %v765_v45 = vpop.permute.xlu1 %764 }
 0x1fa   :  { %v1009_v59 = vmax.f32 %v879_v54, 0.0  ;;  %v1026_v4 = vmax.f32 %v964_v38, 0.0 }
 0x1fb   :  { %v883_v60 = vpop.f32.mrb[16].mxu0  ;;  %v968_v61 = vpop.f32.mrb[16].mxu1 }
 0x1fc   :  { %v1949_v63 = vpack.c.bf16 %v1009_v59, %v1008_v57  ;;  %v969_v39 = vadd.f32 %v968_v61, %v1932_v52  ;;  %v885_v0 = vpop.f32.mrb[17].mxu0  ;;  %v970_v1 = vpop.f32.mrb[17].mxu1  ;;  %v884_v6 = vadd.f32 %v883_v60, %v660_v62 }
 0x1fd   :  { %v680_v62 = vpop.permute.xlu0 %679  ;;  %v685_v43 = vpop.permute.xlu1 %684 }
 0x1fe   :  { %v1027_v7 = vmax.f32 %v969_v39, 0.0  ;;  %v1010_v15 = vmax.f32 %v884_v6, 0.0 }
 0x1ff   :  { %v888_v40 = vpop.f32.mrb[18].mxu0  ;;  %v973_v8 = vpop.f32.mrb[18].mxu1 }
 0x200   :  { %v1952_v11 = vpack.c.bf16 %v1027_v7, %v1026_v4  ;;  %v889_v12 = vadd.f32 %v888_v40, %v665_v10  ;;  %v890_v13 = vpop.f32.mrb[19].mxu0  ;;  %v975_v14 = vpop.f32.mrb[19].mxu1  ;;  %v974_v18 = vadd.f32 %v973_v8, %v750_v20 }
 0x201   :  { %v770_v36 = vpop.permute.xlu0 %769  ;;  %v775_v61 = vpop.permute.xlu1 %774 }
 0x202   :  { %v1011_v17 = vmax.f32 %v889_v12, 0.0  ;;  %v1028_v25 = vmax.f32 %v974_v18, 0.0 }
 0x203   :  { %v893_v19 = vpop.f32.mrb[20].mxu0  ;;  %v978_v21 = vpop.f32.mrb[20].mxu1 }
 0x204   :  { %v1954_v52 = vpack.c.bf16 %v1011_v17, %v1010_v15  ;;  %v979_v22 = vadd.f32 %v978_v21, %v755_v30  ;;  %v895_v23 = vpop.f32.mrb[21].mxu0  ;;  %v980_v24 = vpop.f32.mrb[21].mxu1  ;;  %v894_v2 = vadd.f32 %v893_v19, %v670_v35 }
 0x205   :  { %v690_v12 = vpop.permute.xlu0 %689  ;;  %v695_v15 = vpop.permute.xlu1 %694 }
 0x206   :  { %v1029_v29 = vmax.f32 %v979_v22, 0.0  ;;  %v1012_v44 = vmax.f32 %v894_v2, 0.0  ;;  %v929_v22 = vadd.f32 %v1928_v42, %v1919_v27  ;;  %v1036_v42 = vstv %s1998_s6 }
 0x207   :  { %v898_v9 = vpop.f32.mrb[22].mxu0  ;;  %v983_v31 = vpop.f32.mrb[22].mxu1 }
 0x208   :  { %v1243_v10 = vpack.c.bf16 %v1029_v29, %v1028_v25  ;;  %v899_v32 = vadd.f32 %v898_v9, %v675_v56  ;;  %v900_v33 = vpop.f32.mrb[23].mxu0  ;;  %v985_v41 = vpop.f32.mrb[23].mxu1  ;;  %v984_v46 = vadd.f32 %v983_v31, %v760_v3  ;;  %v1019_v9 = vmax.f32 %v929_v22, 0.0 }
 0x20a   :  { %v1013_v20 = vmax.f32 %v899_v32, 0.0  ;;  %v1030_v54 = vmax.f32 %v984_v46, 0.0 }
 0x20b   :  { %v903_v47 = vpop.f32.mrb[24].mxu0  ;;  %v988_v48 = vpop.f32.mrb[24].mxu1 }
 0x20c   :  { %v1245_v49 = vpack.c.bf16 %v1013_v20, %v1012_v44  ;;  %v989_v30 = vadd.f32 %v988_v48, %v765_v45  ;;  %v905_v50 = vpop.f32.mrb[25].mxu0  ;;  %v990_v51 = vpop.f32.mrb[25].mxu1  ;;  %v904_v35 = vadd.f32 %v903_v47, %v680_v62  ;;  %v1294_v20 = vld [vmem:[%s1992_s0] sm:$0x1]  ;;  %v1122_v48 = vstv %s1999_s7 }
 0x20d   :  { %v1120_v46 = vmul.f32 0.125, %v1294_v20 }
 0x20e   :  { %v1031_v55 = vmax.f32 %v989_v30, 0.0  ;;  %v1014_v39 = vmax.f32 %v904_v35, 0.0 }
 0x20f   :  { %v908_v37 = vpop.f32.mrb[26].mxu0  ;;  %v993_v57 = vpop.f32.mrb[26].mxu1 }
 0x210   :  { %v1247_v59 = vpack.c.bf16 %v1031_v55, %v1030_v54  ;;  %v909_v56 = vadd.f32 %v908_v37, %v685_v43  ;;  %v910_v38 = vpop.f32.mrb[27].mxu0  ;;  %v995_v60 = vpop.f32.mrb[27].mxu1  ;;  %v994_v1 = vadd.f32 %v993_v57, %v770_v36 }
 0x212   :  { %v1015_v0 = vmax.f32 %v909_v56, 0.0  ;;  %v1032_v13 = vmax.f32 %v994_v1, 0.0 }
 0x213   :  { %v913_v3 = vpop.f32.mrb[28].mxu0  ;;  %v998_v4 = vpop.f32.mrb[28].mxu1 }
 0x214   :  { %v1249_v6 = vpack.c.bf16 %v1015_v0, %v1014_v39  ;;  %v999_v7 = vadd.f32 %v998_v4, %v775_v61  ;;  %v915_v40 = vpop.f32.mrb[29].mxu0  ;;  %v1000_v8 = vpop.f32.mrb[29].mxu1  ;;  %v914_v14 = vadd.f32 %v913_v3, %v690_v12 }
 0x216   :  { %v1033_v45 = vmax.f32 %v999_v7, 0.0  ;;  %v1016_v23 = vmax.f32 %v914_v14, 0.0 }
 0x217   :  { %v918_v17 = vpop.f32.mrb[30].mxu0 }
 0x218   :  { %v1251_v18 = vpack.c.bf16 %v1033_v45, %v1032_v13  ;;  %v919_v19 = vadd.f32 %v918_v17, %v695_v15  ;;  %v920_v21 = vpop.f32.mrb[31].mxu0 }
 0x21a   :  { %v1017_v24 = vmax.f32 %v919_v19, 0.0 }
 0x21b   :  { %v923_v62 = vpop.f32.mrb[32].mxu0 }
 0x21c   :  { %v1253_v25 = vpack.c.bf16 %v1017_v24, %v1016_v23  ;;  %v924_v2 = vadd.f32 %v923_v62, %v1917_v26  ;;  %v925_v29 = vpop.f32.mrb[33].mxu0  ;;  %v1034_v26 = vld [vmem:[%s1997_s5] sm:$0xff] }
 0x21e   :  { %v1018_v31 = vmax.f32 %v924_v2, 0.0 }
 0x220   :  { %v1223_v32 = vpack.c.bf16 %v1019_v9, %v1018_v31 }
 0x222   :  { %1224 = vmatprep.subr.bf16.mxu1 %v1223_v32 }
 0x223   :  { %1226 = vmatpush3.bf16.msra.mxu1 %v1934_v58 }
 0x224   :  { %1228 = vmatprep.subr.bf16.mxu1 %v1936_v5 }
 0x227   :  { %1230 = vmatpush3.bf16.msra.mxu1 %v1938_v16 }
 0x228   :  { %1232 = vmatprep.subr.bf16.mxu1 %v1940_v28 }
 0x22b   :  { %1234 = vmatpush3.bf16.msra.mxu1 %v1942_v34 }
 0x22c   :  { %1236 = vmatprep.subr.bf16.mxu1 %v1945_v53 }
 0x22f   :  { %1238 = vmatpush3.bf16.msra.mxu1 %v1949_v63 }
 0x230   :  { %1240 = vmatprep.subr.bf16.mxu1 %v1952_v11 }
 0x233   :  { %1242 = vmatpush3.bf16.msra.mxu1 %v1954_v52 }
 0x234   :  { %1244 = vmatprep.subr.bf16.mxu1 %v1243_v10 }
 0x237   :  { %1246 = vmatpush3.bf16.msra.mxu1 %v1245_v49 }
 0x238   :  { %1248 = vmatprep.subr.bf16.mxu1 %v1247_v59 }
 0x23b   :  { %1250 = vmatpush3.bf16.msra.mxu1 %v1249_v6 }
 0x23c   :  { %1252 = vmatprep.subr.bf16.mxu1 %v1251_v18 }
 0x23f   :  { %1254 = vmatpush3.bf16.msra.mxu1 %v1253_v25 }
 0x242   :  { %1102 = vmatmul.mubr.f32.vlgmr.msra.gmra.mrb[30].mxu1 %v1034_v26 }
 0x315   :  { %v1172_v27 = vpop.f32.mrb[30].mxu1 }
 0x316   :  { %v1173_v58 = vpop.f32.mrb[31].mxu1 }
 0x317   :  { %v1174_v5 = vadd.f32 %v1173_v58, %v1172_v27 }
 0x319   :  { %v1104_v16 = vadd.f32 %v1174_v5, %v1036_v42 }
 0x31b   :  { %v1108_v28 = vmin.f32 %v1104_v16, 0.0  ;;  %vm1107_vm0 = vcmp.gt.f32.partialorder %v1104_v16, 0.0 }
 0x31d   :  { %v1109_v34 = vmul.f32 1.442695, %v1108_v28 }
 0x31f   :  { %1292 = vpow2.f32 %v1109_v34 }
 0x329   :  { %v1293_v53 = vpop.eup %1292 }
 0x32a   :  { %v1139_v63 = vadd.f32 -1.0, %v1293_v53 }
 0x32c   :  { %v1112_v11 = vsel %vm1107_vm0, %v1104_v16, %v1139_v63 }
 0x32d   :  { %v1113_v52 = vadd.f32 1.0, %v1112_v11 }
 0x32f   :  { %v1114_v10 = vrot.slane %v1113_v52, 4 }
 0x331   :  { %v1115_v33 = vadd.f32 %v1114_v10, %v1113_v52 }
 0x333   :  { %v1116_v41 = vrot.slane %v1115_v33, 2 }
 0x335   :  { %v1117_v43 = vadd.f32 %v1116_v41, %v1115_v33 }
 0x337   :  { %v1118_v44 = vrot.slane %v1117_v43, 1 }
 0x339   :  { %v1119_v47 = vadd.f32 %v1118_v44, %v1117_v43 }
 0x33b   :  { %v1121_v49 = vmul.f32 %v1120_v46, %v1119_v47 }
 0x33d   :  { %v1123_v30 = vadd.f32 %v1122_v48, %v1121_v49 }
 0x33f   :  { %1124 = vst [vmem:[#allocation4] sm:$0x1] %v1123_v30 }
 0x340   :  { %1307 = shalt.err (!%p1304_p4)
}
 0x341   :  { %s1308_s29 = scalar_lea.hbm %s2000_s8, 16 }
 0x342   :  { %p1309_p5 = scmp.ne.s32.totalorder %s2000_s8, %s1308_s29  ;;  %p1312_p6 = scmp.lt.u32.totalorder %s1308_s29, %s2000_s8 }
 0x344   :  { %p1314_p7 = pnand %p1312_p6, %p1309_p5 }
 0x346   :  { %1317 = shalt.err (!%p1314_p7)
}
 0x347   :  { %1134 = dma.vmem_to_hbm [thread:$0]  %s1132_s1, 16, %s2000_s8, [#allocation5]  }
 0x348   :  { %1318 = dma.done.wait [#allocation5], 16  }
 0x349   :  { %1319 = vsyncadd [#allocation5], 4294967280 }
 0x34a   :  { %1138 = vsyncpa [#allocation5], 1 }

</bundles_post_ra>
